<compile_context>
chip_gen: v7x
topology: tpu7x:2x2x1
jax: 0.10.0
libtpu: 0.0.40
codegen_flags: <defaults>
</compile_context>

<pallas_src>
import functools
import math

import jax
import jax.numpy as jnp
from jax.experimental import pallas as pl
from jax.experimental.pallas import tpu as pltpu


def _mha_kernel(x_ref, wqkv_ref, bqkv_ref, wo_ref, bo_ref, o_ref, *, B, S, H, dk):
    """Single-step kernel.

    x_ref    : (B*S, D)       flattened feature slab
    wqkv_ref : (D, 3*H*dk)    Q/K/V projection weights packed along lanes
    bqkv_ref : (1, 3*H*dk)    packed Q/K/V biases
    wo_ref   : (H*dk, D)      output projection weight (original 2D layout)
    bo_ref   : (1, D)         output projection bias
    o_ref    : (B*S, D)       output slab
    """
    HDK = H * dk
    inv_sqrt_dk = 1.0 / math.sqrt(dk)

    x2d = x_ref[...]                                             # (B*S, D)

    # ---- Fused Q/K/V projection: one lane-dense MXU push, (B*S, 3*H*dk).
    qkv = jnp.dot(x2d, wqkv_ref[...],
                  preferred_element_type=jnp.float32) + bqkv_ref[...]

    # ---- Per-head scaled dot-product attention.  H is a small static
    # constant, so this Python loop unrolls at trace time; each head is a
    # static lane-slice of the fused projection (no data replication).
    # The (B*S, dk) -> (B, S, dk) reshapes only split the leading dim at the
    # sublane-tile boundary (S == 8), so they are layout-free.
    ctx_heads = []
    for h in range(H):
        qh = qkv[:, h * dk:(h + 1) * dk].reshape(B, S, dk) * inv_sqrt_dk
        kh = qkv[:, HDK + h * dk:HDK + (h + 1) * dk].reshape(B, S, dk)
        vh = qkv[:, 2 * HDK + h * dk:2 * HDK + (h + 1) * dk].reshape(B, S, dk)

        s = jnp.einsum('bqe,bke->bqk', qh, kh,
                       preferred_element_type=jnp.float32)       # (B, S, S)
        s = s - jnp.max(s, axis=-1, keepdims=True)
        e = jnp.exp(s)
        p = e / jnp.sum(e, axis=-1, keepdims=True)               # exact softmax
        ctx_heads.append(jnp.einsum('bqk,bke->bqe', p, vh,
                                    preferred_element_type=jnp.float32))

    # Head concat along the lane axis == torch.cat(zk, dim=-1); merging the
    # leading (B, S) dims back to B*S is again layout-free.
    ctx = jnp.concatenate(ctx_heads, axis=-1).reshape(B * S, HDK)

    # ---- Output projection: one (B*S, H*dk) @ (H*dk, D) MXU push.
    out = jnp.dot(ctx, wo_ref[...],
                  preferred_element_type=jnp.float32) + bo_ref[...]

    # TODO(synk): training-mode dropout (inference path == identity).
    o_ref[...] = out.astype(o_ref.dtype)


def multi_head_attention(feature, wq, bq, wk, bk, wv, bv, wo, bo):
    """feature: (B, S, D) float32.  Per-head weights wq/wk/wv: (H, D, dk),
    biases bq/bk/bv: (H, 1, dk); wo: (H*dk, D), bo: (1, D).  Returns (B, S, D)."""
    B, S, D = feature.shape
    H, _, dk = wq.shape
    HDK = H * dk

    # Pack per-head projections along the output (lane) axis:
    #   wqkv[:, i*HDK + h*dk + e] = w_i[h, :, e]  for i in {q, k, v}.
    def pack_w(w):                       # (H, D, dk) -> (D, H*dk)
        return jnp.transpose(w, (1, 0, 2)).reshape(D, HDK)

    def pack_b(b):                       # (H, 1, dk) -> (H*dk,)
        return b.reshape(HDK)

    wqkv = jnp.concatenate([pack_w(wq), pack_w(wk), pack_w(wv)], axis=1)  # (D, 3*HDK)
    bqkv = jnp.concatenate([pack_b(bq), pack_b(bk), pack_b(bv)])[None, :] # (1, 3*HDK)
    bo2 = bo.reshape(1, D)
    x2d = feature.reshape(B * S, D)

    kernel = functools.partial(_mha_kernel, B=B, S=S, H=H, dk=dk)

    grid_spec = pltpu.PrefetchScalarGridSpec(
        num_scalar_prefetch=0,
        grid=(1,),                                   # one step: whole problem
        in_specs=[
            pl.BlockSpec((B * S, D), lambda i: (0, 0)),        # feature slab
            pl.BlockSpec((D, 3 * HDK), lambda i: (0, 0)),      # packed wqkv
            pl.BlockSpec((1, 3 * HDK), lambda i: (0, 0)),      # packed bqkv
            pl.BlockSpec((HDK, D), lambda i: (0, 0)),          # wo
            pl.BlockSpec((1, D), lambda i: (0, 0)),            # bo
        ],
        out_specs=pl.BlockSpec((B * S, D), lambda i: (0, 0)),
    )

    out2d = pl.pallas_call(
        kernel,
        out_shape=jax.ShapeDtypeStruct((B * S, D), feature.dtype),
        grid_spec=grid_spec,
        compiler_params=pltpu.CompilerParams(
            dimension_semantics=("arbitrary",),
        ),
    )(x2d, wqkv, bqkv, wo, bo2)

    return out2d.reshape(B, S, D)


def _reference(feature, wq, bq, wk, bk, wv, bv, wo, bo):
    """Pure-JAX reference mirroring the PyTorch forward (eval mode).
    Highest matmul precision so the comparison is not polluted by XLA's
    default f32->bf16 demotion on TPU."""
    H, _, dk = wq.shape
    hi = jax.lax.Precision.HIGHEST
    heads = []
    for h in range(H):
        q = jnp.einsum('bsd,de->bse', feature, wq[h], precision=hi) + bq[h]
        k = jnp.einsum('bsd,de->bse', feature, wk[h], precision=hi) + bk[h]
        v = jnp.einsum('bsd,de->bse', feature, wv[h], precision=hi) + bv[h]
        a = jnp.einsum('bqe,bke->bqk', q, k, precision=hi) / math.sqrt(dk)
        a = jax.nn.softmax(a, axis=-1)
        heads.append(jnp.einsum('bqk,bke->bqe', a, v, precision=hi))
    z = jnp.concatenate(heads, axis=-1)                 # (B, S, H*dk)
    return jnp.einsum('bsf,fd->bsd', z, wo, precision=hi) + bo


def _xavier(key, shape_in, shape_out, extra=()):
    bound = math.sqrt(6.0 / (shape_in + shape_out))
    return jax.random.uniform(key, extra + (shape_in, shape_out),
                              minval=-bound, maxval=bound, dtype=jnp.float32)


if __name__ == "__main__":
    # Shapes consistent with the module: n_features=32, n_heads=4 -> dk=8.
    B, S, D, H = 2, 8, 32, 4
    dk = D // H

    key = jax.random.PRNGKey(0)
    keys = jax.random.split(key, 10)

    feature = jax.random.normal(keys[0], (B, S, D), dtype=jnp.float32)

    wq = _xavier(keys[1], D, dk, extra=(H,))           # (H, D, dk)
    wk = _xavier(keys[2], D, dk, extra=(H,))
    wv = _xavier(keys[3], D, dk, extra=(H,))
    wo = _xavier(keys[4], H * dk, D)                   # (H*dk, D)

    bq = 0.01 * jax.random.normal(keys[5], (H, 1, dk), dtype=jnp.float32)
    bk = 0.01 * jax.random.normal(keys[6], (H, 1, dk), dtype=jnp.float32)
    bv = 0.01 * jax.random.normal(keys[7], (H, 1, dk), dtype=jnp.float32)
    bo = 0.01 * jax.random.normal(keys[8], (1, D), dtype=jnp.float32)

    out = multi_head_attention(feature, wq, bq, wk, bk, wv, bv, wo, bo)
    out = jax.block_until_ready(out)

    ref = _reference(feature, wq, bq, wk, bk, wv, bv, wo, bo)
    assert out.shape == (B, S, D)
    assert jnp.allclose(out, ref, atol=1e-3, rtol=1e-3), "mismatch vs reference"

    print("KERNEL_OK")
</pallas_src>

<mosaic_0001>
module attributes {stable_mosaic.version = 11 : i64} {
  func.func @_mha_kernel(%arg0: i32, %arg1: memref<16x32xf32, #tpu.memory_space<vmem>>, %arg2: memref<32x96xf32, #tpu.memory_space<vmem>>, %arg3: memref<1x96xf32, #tpu.memory_space<vmem>>, %arg4: memref<32x32xf32, #tpu.memory_space<vmem>>, %arg5: memref<1x32xf32, #tpu.memory_space<vmem>>, %arg6: memref<16x32xf32, #tpu.memory_space<vmem>>) attributes {dimension_semantics = [#tpu.dimension_semantics<arbitrary>], iteration_bounds = array<i64: 1>, scalar_prefetch = 0 : i64, scratch_operands = 0 : i64, tpu.core_type = #tpu.core_type<tc>, window_params = [{pipeline_mode = #tpu.pipeline_mode<synchronous>, transform_indices = @transform_0, window_bounds = array<i64: 16, 32>}, {pipeline_mode = #tpu.pipeline_mode<synchronous>, transform_indices = @transform_1, window_bounds = array<i64: 32, 96>}, {pipeline_mode = #tpu.pipeline_mode<synchronous>, transform_indices = @transform_2, window_bounds = array<i64: 1, 96>}, {pipeline_mode = #tpu.pipeline_mode<synchronous>, transform_indices = @transform_3, window_bounds = array<i64: 32, 32>}, {pipeline_mode = #tpu.pipeline_mode<synchronous>, transform_indices = @transform_4, window_bounds = array<i64: 1, 32>}, {pipeline_mode = #tpu.pipeline_mode<synchronous>, transform_indices = @transform_5, window_bounds = array<i64: 16, 32>}]} {
    %c0 = arith.constant 0 : index
    %c0_0 = arith.constant 0 : index
    %0 = vector.load %arg1[%c0, %c0_0] : memref<16x32xf32, #tpu.memory_space<vmem>>, vector<16x32xf32>
    %c0_1 = arith.constant 0 : index
    %c0_2 = arith.constant 0 : index
    %1 = vector.load %arg2[%c0_1, %c0_2] : memref<32x96xf32, #tpu.memory_space<vmem>>, vector<32x96xf32>
    %cst = arith.constant dense<0.000000e+00> : vector<16x96xf32>
    %2 = tpu.matmul %0, %1, %cst {dimension_numbers = #tpu.dot_dimension_numbers<[1], [0], [0], [1], [0, 0, 1, 1], [], []>} : vector<16x32xf32>, vector<32x96xf32>, vector<16x96xf32> -> vector<16x96xf32>
    %c0_3 = arith.constant 0 : index
    %c0_4 = arith.constant 0 : index
    %3 = vector.load %arg3[%c0_3, %c0_4] : memref<1x96xf32, #tpu.memory_space<vmem>>, vector<1x96xf32>
    %4 = vector.broadcast %3 : vector<1x96xf32> to vector<16x96xf32>
    %5 = arith.addf %2, %4 : vector<16x96xf32>
    %6 = vector.extract_strided_slice %5 {offsets = [0, 0], sizes = [16, 8], strides = [1, 1]} : vector<16x96xf32> to vector<16x8xf32>
    %7 = vector.shape_cast %6 : vector<16x8xf32> to vector<2x8x8xf32>
    %cst_5 = arith.constant 0.353553385 : f32
    %8 = vector.broadcast %cst_5 : f32 to vector<2x8x8xf32>
    %9 = arith.mulf %7, %8 : vector<2x8x8xf32>
    %10 = vector.extract_strided_slice %5 {offsets = [0, 32], sizes = [16, 8], strides = [1, 1]} : vector<16x96xf32> to vector<16x8xf32>
    %11 = vector.shape_cast %10 : vector<16x8xf32> to vector<2x8x8xf32>
    %12 = vector.extract_strided_slice %5 {offsets = [0, 64], sizes = [16, 8], strides = [1, 1]} : vector<16x96xf32> to vector<16x8xf32>
    %13 = vector.shape_cast %12 : vector<16x8xf32> to vector<2x8x8xf32>
    "tpu.trace_start"() <{level = 10 : i32, message = "bqe,bke->bqk"}> : () -> ()
    %cst_6 = arith.constant dense<0.000000e+00> : vector<2x8x8xf32>
    %14 = tpu.matmul %9, %11, %cst_6 {dimension_numbers = #tpu.dot_dimension_numbers<[2], [2], [1], [1], [0, 0, 0, 1, 1, 1], [0], [0]>} : vector<2x8x8xf32>, vector<2x8x8xf32>, vector<2x8x8xf32> -> vector<2x8x8xf32>
    "tpu.trace_stop"() : () -> ()
    %cst_7 = arith.constant dense<0xFF800000> : vector<2x8xf32>
    %15 = vector.multi_reduction <maximumf>, %14, %cst_7 [2] : vector<2x8x8xf32> to vector<2x8xf32>
    %16 = vector.shape_cast %15 : vector<2x8xf32> to vector<2x8x1xf32>
    %17 = vector.broadcast %16 : vector<2x8x1xf32> to vector<2x8x8xf32>
    %18 = arith.subf %14, %17 : vector<2x8x8xf32>
    %19 = math.exp %18 : vector<2x8x8xf32>
    %cst_8 = arith.constant dense<0.000000e+00> : vector<2x8xf32>
    %20 = vector.multi_reduction <add>, %19, %cst_8 [2] : vector<2x8x8xf32> to vector<2x8xf32>
    %21 = vector.shape_cast %20 : vector<2x8xf32> to vector<2x8x1xf32>
    %22 = vector.broadcast %21 : vector<2x8x1xf32> to vector<2x8x8xf32>
    %23 = arith.divf %19, %22 : vector<2x8x8xf32>
    "tpu.trace_start"() <{level = 10 : i32, message = "bqk,bke->bqe"}> : () -> ()
    %cst_9 = arith.constant dense<0.000000e+00> : vector<2x8x8xf32>
    %24 = tpu.matmul %23, %13, %cst_9 {dimension_numbers = #tpu.dot_dimension_numbers<[2], [1], [1], [2], [0, 0, 0, 1, 1, 2], [0], [0]>} : vector<2x8x8xf32>, vector<2x8x8xf32>, vector<2x8x8xf32> -> vector<2x8x8xf32>
    "tpu.trace_stop"() : () -> ()
    %25 = vector.extract_strided_slice %5 {offsets = [0, 8], sizes = [16, 8], strides = [1, 1]} : vector<16x96xf32> to vector<16x8xf32>
    %26 = vector.shape_cast %25 : vector<16x8xf32> to vector<2x8x8xf32>
    %cst_10 = arith.constant 0.353553385 : f32
    %27 = vector.broadcast %cst_10 : f32 to vector<2x8x8xf32>
    %28 = arith.mulf %26, %27 : vector<2x8x8xf32>
    %29 = vector.extract_strided_slice %5 {offsets = [0, 40], sizes = [16, 8], strides = [1, 1]} : vector<16x96xf32> to vector<16x8xf32>
    %30 = vector.shape_cast %29 : vector<16x8xf32> to vector<2x8x8xf32>
    %31 = vector.extract_strided_slice %5 {offsets = [0, 72], sizes = [16, 8], strides = [1, 1]} : vector<16x96xf32> to vector<16x8xf32>
    %32 = vector.shape_cast %31 : vector<16x8xf32> to vector<2x8x8xf32>
    "tpu.trace_start"() <{level = 10 : i32, message = "bqe,bke->bqk"}> : () -> ()
    %cst_11 = arith.constant dense<0.000000e+00> : vector<2x8x8xf32>
    %33 = tpu.matmul %28, %30, %cst_11 {dimension_numbers = #tpu.dot_dimension_numbers<[2], [2], [1], [1], [0, 0, 0, 1, 1, 1], [0], [0]>} : vector<2x8x8xf32>, vector<2x8x8xf32>, vector<2x8x8xf32> -> vector<2x8x8xf32>
    "tpu.trace_stop"() : () -> ()
    %cst_12 = arith.constant dense<0xFF800000> : vector<2x8xf32>
    %34 = vector.multi_reduction <maximumf>, %33, %cst_12 [2] : vector<2x8x8xf32> to vector<2x8xf32>
    %35 = vector.shape_cast %34 : vector<2x8xf32> to vector<2x8x1xf32>
    %36 = vector.broadcast %35 : vector<2x8x1xf32> to vector<2x8x8xf32>
    %37 = arith.subf %33, %36 : vector<2x8x8xf32>
    %38 = math.exp %37 : vector<2x8x8xf32>
    %cst_13 = arith.constant dense<0.000000e+00> : vector<2x8xf32>
    %39 = vector.multi_reduction <add>, %38, %cst_13 [2] : vector<2x8x8xf32> to vector<2x8xf32>
    %40 = vector.shape_cast %39 : vector<2x8xf32> to vector<2x8x1xf32>
    %41 = vector.broadcast %40 : vector<2x8x1xf32> to vector<2x8x8xf32>
    %42 = arith.divf %38, %41 : vector<2x8x8xf32>
    "tpu.trace_start"() <{level = 10 : i32, message = "bqk,bke->bqe"}> : () -> ()
    %cst_14 = arith.constant dense<0.000000e+00> : vector<2x8x8xf32>
    %43 = tpu.matmul %42, %32, %cst_14 {dimension_numbers = #tpu.dot_dimension_numbers<[2], [1], [1], [2], [0, 0, 0, 1, 1, 2], [0], [0]>} : vector<2x8x8xf32>, vector<2x8x8xf32>, vector<2x8x8xf32> -> vector<2x8x8xf32>
    "tpu.trace_stop"() : () -> ()
    %44 = vector.extract_strided_slice %5 {offsets = [0, 16], sizes = [16, 8], strides = [1, 1]} : vector<16x96xf32> to vector<16x8xf32>
    %45 = vector.shape_cast %44 : vector<16x8xf32> to vector<2x8x8xf32>
    %cst_15 = arith.constant 0.353553385 : f32
    %46 = vector.broadcast %cst_15 : f32 to vector<2x8x8xf32>
    %47 = arith.mulf %45, %46 : vector<2x8x8xf32>
    %48 = vector.extract_strided_slice %5 {offsets = [0, 48], sizes = [16, 8], strides = [1, 1]} : vector<16x96xf32> to vector<16x8xf32>
    %49 = vector.shape_cast %48 : vector<16x8xf32> to vector<2x8x8xf32>
    %50 = vector.extract_strided_slice %5 {offsets = [0, 80], sizes = [16, 8], strides = [1, 1]} : vector<16x96xf32> to vector<16x8xf32>
    %51 = vector.shape_cast %50 : vector<16x8xf32> to vector<2x8x8xf32>
    "tpu.trace_start"() <{level = 10 : i32, message = "bqe,bke->bqk"}> : () -> ()
    %cst_16 = arith.constant dense<0.000000e+00> : vector<2x8x8xf32>
    %52 = tpu.matmul %47, %49, %cst_16 {dimension_numbers = #tpu.dot_dimension_numbers<[2], [2], [1], [1], [0, 0, 0, 1, 1, 1], [0], [0]>} : vector<2x8x8xf32>, vector<2x8x8xf32>, vector<2x8x8xf32> -> vector<2x8x8xf32>
    "tpu.trace_stop"() : () -> ()
    %cst_17 = arith.constant dense<0xFF800000> : vector<2x8xf32>
    %53 = vector.multi_reduction <maximumf>, %52, %cst_17 [2] : vector<2x8x8xf32> to vector<2x8xf32>
    %54 = vector.shape_cast %53 : vector<2x8xf32> to vector<2x8x1xf32>
    %55 = vector.broadcast %54 : vector<2x8x1xf32> to vector<2x8x8xf32>
    %56 = arith.subf %52, %55 : vector<2x8x8xf32>
    %57 = math.exp %56 : vector<2x8x8xf32>
    %cst_18 = arith.constant dense<0.000000e+00> : vector<2x8xf32>
    %58 = vector.multi_reduction <add>, %57, %cst_18 [2] : vector<2x8x8xf32> to vector<2x8xf32>
    %59 = vector.shape_cast %58 : vector<2x8xf32> to vector<2x8x1xf32>
    %60 = vector.broadcast %59 : vector<2x8x1xf32> to vector<2x8x8xf32>
    %61 = arith.divf %57, %60 : vector<2x8x8xf32>
    "tpu.trace_start"() <{level = 10 : i32, message = "bqk,bke->bqe"}> : () -> ()
    %cst_19 = arith.constant dense<0.000000e+00> : vector<2x8x8xf32>
    %62 = tpu.matmul %61, %51, %cst_19 {dimension_numbers = #tpu.dot_dimension_numbers<[2], [1], [1], [2], [0, 0, 0, 1, 1, 2], [0], [0]>} : vector<2x8x8xf32>, vector<2x8x8xf32>, vector<2x8x8xf32> -> vector<2x8x8xf32>
    "tpu.trace_stop"() : () -> ()
    %63 = vector.extract_strided_slice %5 {offsets = [0, 24], sizes = [16, 8], strides = [1, 1]} : vector<16x96xf32> to vector<16x8xf32>
    %64 = vector.shape_cast %63 : vector<16x8xf32> to vector<2x8x8xf32>
    %cst_20 = arith.constant 0.353553385 : f32
    %65 = vector.broadcast %cst_20 : f32 to vector<2x8x8xf32>
    %66 = arith.mulf %64, %65 : vector<2x8x8xf32>
    %67 = vector.extract_strided_slice %5 {offsets = [0, 56], sizes = [16, 8], strides = [1, 1]} : vector<16x96xf32> to vector<16x8xf32>
    %68 = vector.shape_cast %67 : vector<16x8xf32> to vector<2x8x8xf32>
    %69 = vector.extract_strided_slice %5 {offsets = [0, 88], sizes = [16, 8], strides = [1, 1]} : vector<16x96xf32> to vector<16x8xf32>
    %70 = vector.shape_cast %69 : vector<16x8xf32> to vector<2x8x8xf32>
    "tpu.trace_start"() <{level = 10 : i32, message = "bqe,bke->bqk"}> : () -> ()
    %cst_21 = arith.constant dense<0.000000e+00> : vector<2x8x8xf32>
    %71 = tpu.matmul %66, %68, %cst_21 {dimension_numbers = #tpu.dot_dimension_numbers<[2], [2], [1], [1], [0, 0, 0, 1, 1, 1], [0], [0]>} : vector<2x8x8xf32>, vector<2x8x8xf32>, vector<2x8x8xf32> -> vector<2x8x8xf32>
    "tpu.trace_stop"() : () -> ()
    %cst_22 = arith.constant dense<0xFF800000> : vector<2x8xf32>
    %72 = vector.multi_reduction <maximumf>, %71, %cst_22 [2] : vector<2x8x8xf32> to vector<2x8xf32>
    %73 = vector.shape_cast %72 : vector<2x8xf32> to vector<2x8x1xf32>
    %74 = vector.broadcast %73 : vector<2x8x1xf32> to vector<2x8x8xf32>
    %75 = arith.subf %71, %74 : vector<2x8x8xf32>
    %76 = math.exp %75 : vector<2x8x8xf32>
    %cst_23 = arith.constant dense<0.000000e+00> : vector<2x8xf32>
    %77 = vector.multi_reduction <add>, %76, %cst_23 [2] : vector<2x8x8xf32> to vector<2x8xf32>
    %78 = vector.shape_cast %77 : vector<2x8xf32> to vector<2x8x1xf32>
    %79 = vector.broadcast %78 : vector<2x8x1xf32> to vector<2x8x8xf32>
    %80 = arith.divf %76, %79 : vector<2x8x8xf32>
    "tpu.trace_start"() <{level = 10 : i32, message = "bqk,bke->bqe"}> : () -> ()
    %cst_24 = arith.constant dense<0.000000e+00> : vector<2x8x8xf32>
    %81 = tpu.matmul %80, %70, %cst_24 {dimension_numbers = #tpu.dot_dimension_numbers<[2], [1], [1], [2], [0, 0, 0, 1, 1, 2], [0], [0]>} : vector<2x8x8xf32>, vector<2x8x8xf32>, vector<2x8x8xf32> -> vector<2x8x8xf32>
    "tpu.trace_stop"() : () -> ()
    %82 = tpu.concatenate %24, %43, %62, %81 in 2 : vector<2x8x8xf32>, vector<2x8x8xf32>, vector<2x8x8xf32>, vector<2x8x8xf32> -> vector<2x8x32xf32>
    %83 = vector.shape_cast %82 : vector<2x8x32xf32> to vector<16x32xf32>
    %c0_25 = arith.constant 0 : index
    %c0_26 = arith.constant 0 : index
    %84 = vector.load %arg4[%c0_25, %c0_26] : memref<32x32xf32, #tpu.memory_space<vmem>>, vector<32x32xf32>
    %cst_27 = arith.constant dense<0.000000e+00> : vector<16x32xf32>
    %85 = tpu.matmul %83, %84, %cst_27 {dimension_numbers = #tpu.dot_dimension_numbers<[1], [0], [0], [1], [0, 0, 1, 1], [], []>} : vector<16x32xf32>, vector<32x32xf32>, vector<16x32xf32> -> vector<16x32xf32>
    %c0_28 = arith.constant 0 : index
    %c0_29 = arith.constant 0 : index
    %86 = vector.load %arg5[%c0_28, %c0_29] : memref<1x32xf32, #tpu.memory_space<vmem>>, vector<1x32xf32>
    %87 = vector.broadcast %86 : vector<1x32xf32> to vector<16x32xf32>
    %88 = arith.addf %85, %87 : vector<16x32xf32>
    %c0_30 = arith.constant 0 : index
    %c0_31 = arith.constant 0 : index
    %89 = vector.load %arg6[%c0_30, %c0_31] : memref<16x32xf32, #tpu.memory_space<vmem>>, vector<16x32xf32>
    tpu.vector_store %arg6[%c0_30, %c0_31], %88 {strides = array<i32>} : memref<16x32xf32, #tpu.memory_space<vmem>>, vector<16x32xf32>,
    return
  }
  func.func @transform_0(%arg0: i32) -> (i32, i32) {
    %c0_i32 = arith.constant 0 : i32
    %c0_i32_0 = arith.constant 0 : i32
    %c0_i32_1 = arith.constant 0 : i32
    return %c0_i32, %c0_i32_0 : i32, i32
  }
  func.func @transform_1(%arg0: i32) -> (i32, i32) {
    %c0_i32 = arith.constant 0 : i32
    %c0_i32_0 = arith.constant 0 : i32
    %c0_i32_1 = arith.constant 0 : i32
    return %c0_i32, %c0_i32_0 : i32, i32
  }
  func.func @transform_2(%arg0: i32) -> (i32, i32) {
    %c0_i32 = arith.constant 0 : i32
    %c0_i32_0 = arith.constant 0 : i32
    %c0_i32_1 = arith.constant 0 : i32
    return %c0_i32, %c0_i32_0 : i32, i32
  }
  func.func @transform_3(%arg0: i32) -> (i32, i32) {
    %c0_i32 = arith.constant 0 : i32
    %c0_i32_0 = arith.constant 0 : i32
    %c0_i32_1 = arith.constant 0 : i32
    return %c0_i32, %c0_i32_0 : i32, i32
  }
  func.func @transform_4(%arg0: i32) -> (i32, i32) {
    %c0_i32 = arith.constant 0 : i32
    %c0_i32_0 = arith.constant 0 : i32
    %c0_i32_1 = arith.constant 0 : i32
    return %c0_i32, %c0_i32_0 : i32, i32
  }
  func.func @transform_5(%arg0: i32) -> (i32, i32) {
    %c0_i32 = arith.constant 0 : i32
    %c0_i32_0 = arith.constant 0 : i32
    %c0_i32_1 = arith.constant 0 : i32
    return %c0_i32, %c0_i32_0 : i32, i32
  }
}

</mosaic_0001>

<bundles_post_ra>
// kernel: tpu_custom_call.1
= control target key start
LH: loop header
LB: loop body
LE: loop exit
PB: predicated region body
PF: predicated region fallthrough
CT: control target
= control target key end

     0   :  { %10 = vsyncpa [#allocation3], 0  ;;  %s2231_s0 = inlined_call_operand.hbm [shape: f32[16,32], index: 0, kind: input, shape index: {}]   ;;  %s2232_s1 = inlined_call_operand.hbm [shape: f32[32,96], index: 1, kind: input, shape index: {}]   ;;  %s2233_s2 = inlined_call_operand.vmem [shape: f32[1,96], index: 2, kind: input, shape index: {}]   ;;  %s2234_s3 = inlined_call_operand.hbm [shape: f32[32,32], index: 3, kind: input, shape index: {}]   ;;  %s2235_s4 = inlined_call_operand.vmem [shape: f32[1,32], index: 4, kind: input, shape index: {}]   ;;  %s2236_s5 = inlined_call_operand.hbm [shape: f32[16,32], index: 5, kind: output, shape index: {}]  }
   0x1   :  { %11 = vsyncpa [#allocation6], 0 }
   0x2   :  { %12 = vsyncpa [#allocation4], 0  ;;  %s1963_s18 = smov [#allocation5]   ;;  %s1964_s20 = smov [#allocation2]  }
   0x3   :  { %s30_s19 = sshll.u32 %s1963_s18, 4  ;;  %s18_s21 = sshll.u32 %s1964_s20, 4  ;;  %s31_s19 = int_to_ptr.vmem [resolvable:$true] %s30_s19  ;;  %s2014_s21 = int_to_ptr.vmem [resolvable:$true] %s18_s21 }
   0x4   :  { %s1869_s24 = scalar_lea.hbm %s2232_s1, 512 }
   0x5   :  { %p1870_p0 = scmp.ne.s32.totalorder %s2232_s1, %s1869_s24  ;;  %p1873_p1 = scmp.lt.u32.totalorder %s1869_s24, %s2232_s1 }
   0x7   :  { %p1875_p2 = pnand %p1873_p1, %p1870_p0 }
   0x9   :  { %1878 = shalt.err (!%p1875_p2)
}
   0xa   :  { %s1879_s29 = scalar_lea.vmem %s31_s19, 512  ;;  %p1884_p4 = scmp.lt.s32.totalorder %s31_s19, %s31_s19 }
   0xb   :  { %p1880_p3 = scmp.ne.s32.totalorder %s31_s19, %s1879_s29  ;;  %p1885_p5 = scmp.lt.s32.totalorder %s1879_s29, %s1879_s29 }
   0xd   :  { %p1886_p6 = por %p1885_p5, %p1884_p4 }
   0xf   :  { %p1887_p7 = pnand %p1886_p6, %p1880_p3 }
  0x11   :  { %1890 = shalt.err (!%p1887_p7)
}
  0x12   :  { %s1965_s30 = smov 128   ;;  %s1966_s6 = smov 8  }
  0x13   :  { %36 = dma.hbm_to_vmem [thread:$0]  %s2232_s1, 512, %s31_s19, [#allocation6], %s1965_s30, %s1965_s30, %s1966_s6  }
  0x14   :  { %s1891_s11 = scalar_lea.hbm %s2231_s0, 256 }
  0x15   :  { %p1892_p8 = scmp.ne.s32.totalorder %s2231_s0, %s1891_s11  ;;  %p1895_p9 = scmp.lt.u32.totalorder %s1891_s11, %s2231_s0 }
  0x17   :  { %p1897_p10 = pnand %p1895_p9, %p1892_p8 }
  0x19   :  { %1900 = shalt.err (!%p1897_p10)
}
  0x1a   :  { %s1901_s16 = scalar_lea.vmem %s2014_s21, 256  ;;  %p1906_p12 = scmp.lt.s32.totalorder %s2014_s21, %s2014_s21 }
  0x1b   :  { %p1902_p11 = scmp.ne.s32.totalorder %s2014_s21, %s1901_s16  ;;  %p1907_p13 = scmp.lt.s32.totalorder %s1901_s16, %s1901_s16 }
  0x1d   :  { %p1908_p0 = por %p1907_p13, %p1906_p12 }
  0x1f   :  { %p1909_p1 = pnand %p1908_p0, %p1902_p11 }
  0x21   :  { %1912 = shalt.err (!%p1909_p1)
}
  0x22   :  { %24 = dma.hbm_to_vmem [thread:$0]  %s2231_s0, 256, %s2014_s21, [#allocation3], %s1965_s30, %s1965_s30, %s1966_s6  }
  0x23   :  { %s1967_s18 = smov [#allocation7]   ;;  %s1913_s23 = scalar_lea.hbm %s2234_s3, 512 }
  0x24   :  { %s44_s19 = sshll.u32 %s1967_s18, 4  ;;  %p1914_p2 = scmp.ne.s32.totalorder %s2234_s3, %s1913_s23  ;;  %s45_s19 = int_to_ptr.vmem [resolvable:$true] %s44_s19 }
  0x25   :  { %p1917_p3 = scmp.lt.u32.totalorder %s1913_s23, %s2234_s3 }
  0x27   :  { %p1919_p4 = pnand %p1917_p3, %p1914_p2 }
  0x29   :  { %1922 = shalt.err (!%p1919_p4)
}
  0x2a   :  { %s1923_s28 = scalar_lea.vmem %s45_s19, 512  ;;  %p1928_p6 = scmp.lt.s32.totalorder %s45_s19, %s45_s19 }
  0x2b   :  { %p1924_p5 = scmp.ne.s32.totalorder %s45_s19, %s1923_s28  ;;  %p1929_p7 = scmp.lt.s32.totalorder %s1923_s28, %s1923_s28 }
  0x2d   :  { %p1930_p8 = por %p1929_p7, %p1928_p6 }
  0x2f   :  { %p1931_p9 = pnand %p1930_p8, %p1924_p5 }
  0x31   :  { %1934 = shalt.err (!%p1931_p9)
}
  0x32   :  { %50 = dma.hbm_to_vmem [thread:$0]  %s2234_s3, 512, %s45_s19, [#allocation6], %s1965_s30, %s1965_s30, %s1966_s6  }
  0x33   :  { %1957 = dma.done.wait [#allocation3], 256  }
  0x34   :  { %1958 = vsyncadd [#allocation3], 4294967040 }
  0x35   :  { %1959 = dma.done.wait [#allocation6], 1024  }
  0x36   :  { %1960 = vsyncadd [#allocation6], 4294966272  ;;  %vm75_vm0 = vcmask 261120   ;;  %v64_v0 = vld [vmem:[#allocation5] sm:$0xff]  ;;  %v65_v1 = vld [vmem:[#allocation5 + $0x8] sm:$0xff]  ;;  %v1968_v8 = vmov 0.0  }
  0x37   :  { %v66_v2 = vld [vmem:[#allocation5 + $0x10] sm:$0xff]  ;;  %v1800_v3 = vpack.c.bf16 %v65_v1, %v64_v0  ;;  %v67_v4 = vld [vmem:[#allocation5 + $0x18] sm:$0xff]  ;;  %1709 = vmatprep.subr.mxu1 %v1968_v8  ;;  %vm1969_vm1 = vmmov 0   ;;  %s1970_s7 = smov 96   ;;  %vm162_vm2 = vcmask 64512   ;;  %s1972_s8 = smov 88  }
  0x38   :  { %v62_v5 = vld [vmem:[#allocation2] sm:$0xff]  ;;  %v1804_v6 = vpack.c.bf16 %v67_v4, %v66_v2  ;;  %v63_v7 = vld [vmem:[#allocation2 + $0x8] sm:$0xff]  ;;  %1711 = vmatprep.mubr.msk.f32.mxu1 %vm1969_vm1, %v1968_v8  ;;  %s1973_s9 = smov 120   ;;  %s1974_s10 = smov 56   ;;  %vm1509_vm3 = vcmask 195584   ;;  %vm1506_vm4 = vcmask 130048  }
  0x39   :  { %1706 = vmatprep.mubr.msk.f32.mxu0 %vm75_vm0, %v62_v5  ;;  %1801 = vmatprep.subr.bf16.mxu0 %v1800_v3  ;;  %v1624_v9 = vld [vmem:[%s2233_s2] ss:$0 sm:$0xff]  ;;  %s1971_s2 = smov 64   ;;  %s1975_s11 = smov 112  }
  0x3a   :  { %1803 = vmatpush3.bf16.msra.mxu0 %v1800_v3  ;;  %s1976_s12 = smov 80   ;;  %s1977_s13 = smov 48  }
  0x3b   :  { %1805 = vmatprep.subr.bf16.mxu0 %v1804_v6  ;;  %s1978_s14 = smov 72   ;;  %s1979_s15 = smov 104  }
  0x3c   :  { %s1980_s16 = smov 40   ;;  %s1981_s1 = smov 16  }
  0x3d   :  { %s1982_s17 = smov 24   ;;  %s1983_s20 = smov [#allocation8]  }
  0x3e   :  { %1807 = vmatpush3.bf16.msra.mxu0 %v1804_v6  ;;  %s1611_s22 = sshll.u32 %s1983_s20, 4  ;;  %s1612_s22 = int_to_ptr.vmem [resolvable:$true] %s1611_s22 }
  0x3f   :  { %1729 = vmatprep.subr.mxu0 %v1968_v8  ;;  %s1935_s23 = scalar_lea.vmem %s1612_s22, 256  ;;  %p1940_p11 = scmp.lt.s32.totalorder %s1612_s22, %s1612_s22 }
  0x40   :  { %p1936_p10 = scmp.ne.s32.totalorder %s1612_s22, %s1935_s23  ;;  %p1941_p12 = scmp.lt.s32.totalorder %s1935_s23, %s1935_s23 }
  0x41   :  { %1707 = vmatmul.mubr.msk.f32.vlgmr.msra.gmra.mrb[0].mxu0 %vm75_vm0, %v63_v7 }
  0x42   :  { %1731 = vmatprep.mubr.msk.f32.mxu0 %vm1969_vm1, %v1968_v8  ;;  %p1942_p13 = por %p1941_p12, %p1940_p11 }
  0x44   :  { %p1943_p0 = pnand %p1942_p13, %p1936_p10 }
 0x114   :  { %v1708_v10 = vpop.f32.mrb[0].mxu0 }
 0x115   :  { %v148_v11 = vpop.f32.mrb[1].mxu0  ;;  %v2080_v13 = vadd.f32 %v1708_v10, %v1624_v9 }
 0x116   :  { %v2077_v12 = vadd.f32 %v1624_v9, %v148_v11 }
 0x117   :  { %v2094_v17 = vmul.f32 0.35355338, %v2080_v13 }
 0x118   :  { %160 = vrot.lane.b32.xlu0 %v2077_v12, %s1970_s7  ;;  %v2086_v15 = vmul.f32 0.35355338, %v2077_v12 }
 0x11c   :  { %239 = vrot.lane.b32.xlu0 %v2080_v13, %s1970_s7 }
 0x18a   :  { %v161_v14 = vpop.permute.xlu0 %160 }
 0x18b   :  { %1710 = vmatpush3.xpose.msk.msra.mxu1 %vm162_vm2, %v161_v14 }
 0x18c   :  { %1714 = vmatprep.subr.mxu1 %v1968_v8 }
 0x18e   :  { %v240_v16 = vpop.permute.xlu0 %239  ;;  %1712 = vmatmul.mubr.msk.f32.vlgmr.msra.gmra.mrb[0].mxu1 %vm162_vm2, %v2086_v15 }
 0x18f   :  { %1715 = vmatpush3.xpose.msk.msra.mxu1 %vm162_vm2, %v240_v16  ;;  %1716 = vmatprep.mubr.msk.f32.mxu1 %vm1969_vm1, %v1968_v8 }
 0x190   :  { %1719 = vmatprep.subr.mxu1 %v1968_v8 }
 0x192   :  { %1717 = vmatmul.mubr.msk.f32.vlgmr.msra.gmra.mrb[2].mxu1 %vm162_vm2, %v2094_v17 }
 0x193   :  { %1721 = vmatprep.mubr.msk.f32.mxu1 %vm1969_vm1, %v1968_v8 }
 0x261   :  { %v234_v18 = vpop.f32.mrb[0].mxu1 }
 0x262   :  { %v1713_v19 = vpop.f32.mrb[1].mxu1  ;;  %v316_v20 = vsel %vm162_vm2, %v234_v18, -inf }
 0x263   :  { %317 = vmax.xlane.f32.xlu1 %v316_v20 }
 0x265   :  { %v312_v21 = vpop.f32.mrb[2].mxu1 }
 0x266   :  { %v1718_v22 = vpop.f32.mrb[3].mxu1  ;;  %v319_v23 = vsel %vm162_vm2, %v312_v21, -inf }
 0x267   :  { %320 = vmax.xlane.f32.xlu1 %v319_v23 }
 0x278   :  { %338 = vrot.lane.b32.xlu1 %v2077_v12, %s1971_s2 }
 0x27c   :  { %414 = vrot.lane.b32.xlu1 %v2080_v13, %s1971_s2 }
 0x280   :  { %492 = vrot.lane.b32.xlu1 %v2077_v12, %s1972_s8 }
 0x284   :  { %570 = vrot.lane.b32.xlu1 %v2080_v13, %s1972_s8 }
 0x2f0   :  { %v318_v24 = vpop.xlane.xlu1 %317 }
 0x2f1   :  { %v322_v25 = vsub.f32 %v234_v18, %v318_v24 }
 0x2f3   :  { %v324_v26 = vmul.f32 1.442695, %v322_v25 }
 0x2f4   :  { %v321_v27 = vpop.xlane.xlu1 %320 }
 0x2f5   :  { %1837 = vpow2.f32 %v324_v26  ;;  %v323_v28 = vsub.f32 %v312_v21, %v321_v27 }
 0x2f7   :  { %v326_v29 = vmul.f32 1.442695, %v323_v28 }
 0x2f8   :  { %v339_v30 = vpop.permute.xlu1 %338 }
 0x2f9   :  { %1839 = vpow2.f32 %v326_v29  ;;  %1720 = vmatpush3.msra.mxu1 %v339_v30 }
 0x2fa   :  { %1724 = vmatprep.subr.mxu1 %v1968_v8 }
 0x2fc   :  { %v415_v31 = vpop.permute.xlu1 %414 }
 0x2ff   :  { %v1838_v32 = vpop.eup %1837 }
 0x300   :  { %v493_v33 = vpop.permute.xlu1 %492  ;;  %v328_v34 = vsel %vm162_vm2, %v1838_v32, 0.0 }
 0x301   :  { %329 = vadd.xlane.f32.xlu0 %v328_v34  ;;  %1730 = vmatpush3.xpose.msk.msra.mxu0 %vm162_vm2, %v493_v33 }
 0x302   :  { %1739 = vmatprep.subr.mxu0 %v1968_v8 }
 0x303   :  { %v1840_v35 = vpop.eup %1839 }
 0x304   :  { %v331_v36 = vsel %vm162_vm2, %v1840_v35, 0.0  ;;  %v571_v37 = vpop.permute.xlu1 %570 }
 0x305   :  { %332 = vadd.xlane.f32.xlu1 %v331_v36 }
 0x316   :  { %568 = vrot.lane.b32.xlu1 %v2094_v17, %s1973_s9 }
 0x317   :  { %490 = vrot.lane.b32.xlu0 %v2086_v15, %s1973_s9 }
 0x38e   :  { %v330_v38 = vpop.xlane.xlu0 %329 }
 0x38f   :  { %1841 = vrcp.f32 %v330_v38 }
 0x392   :  { %v491_v39 = vpop.permute.xlu0 %490  ;;  %v333_v40 = vpop.xlane.xlu1 %332 }
 0x393   :  { %1843 = vrcp.f32 %v333_v40  ;;  %1732 = vmatmul.mubr.msk.f32.vlgmr.msra.gmra.mrb[2].mxu0 %vm162_vm2, %v491_v39 }
 0x394   :  { %1741 = vmatprep.mubr.msk.f32.mxu0 %vm1969_vm1, %v1968_v8 }
 0x396   :  { %v569_v45 = vpop.permute.xlu1 %568 }
 0x399   :  { %v1842_v41 = vpop.eup %1841 }
 0x39a   :  { %v335_v42 = vmul.f32 %v1842_v41, %v1838_v32 }
 0x39c   :  { %1722 = vmatmul.mubr.msk.f32.vlgmr.msra.gmra.mrb[4].mxu1 %vm162_vm2, %v335_v42 }
 0x39d   :  { %v1844_v43 = vpop.eup %1843  ;;  %1725 = vmatpush3.msra.mxu1 %v415_v31  ;;  %1726 = vmatprep.mubr.msk.f32.mxu1 %vm1969_vm1, %v1968_v8 }
 0x39e   :  { %v337_v44 = vmul.f32 %v1844_v43, %v1840_v35  ;;  %1734 = vmatprep.subr.mxu1 %v1968_v8 }
 0x3a0   :  { %1727 = vmatmul.mubr.msk.f32.vlgmr.msra.gmra.mrb[6].mxu1 %vm162_vm2, %v337_v44 }
 0x3a1   :  { %1736 = vmatprep.mubr.msk.f32.mxu1 %vm1969_vm1, %v1968_v8 }
 0x3a4   :  { %1735 = vmatpush3.xpose.msk.msra.mxu1 %vm162_vm2, %v571_v37 }
 0x3a5   :  { %1744 = vmatprep.subr.mxu1 %v1968_v8 }
 0x3a7   :  { %1737 = vmatmul.mubr.msk.f32.vlgmr.msra.gmra.mrb[8].mxu1 %vm162_vm2, %v569_v45 }
 0x3a8   :  { %1746 = vmatprep.mubr.msk.f32.mxu1 %vm1969_vm1, %v1968_v8 }
 0x466   :  { %v564_v46 = vpop.f32.mrb[2].mxu0 }
 0x467   :  { %v1733_v47 = vpop.f32.mrb[3].mxu0  ;;  %v646_v48 = vsel %vm162_vm2, %v564_v46, -inf }
 0x468   :  { %647 = vmax.xlane.f32.xlu1 %v646_v48 }
 0x46f   :  { %v2130_v49 = vpop.f32.mrb[4].mxu1 }
 0x470   :  { %v1723_v50 = vpop.f32.mrb[5].mxu1 }
 0x473   :  { %v2132_v51 = vpop.f32.mrb[6].mxu1 }
 0x474   :  { %v1728_v52 = vpop.f32.mrb[7].mxu1 }
 0x47a   :  { %v642_v53 = vpop.f32.mrb[8].mxu1 }
 0x47b   :  { %v1738_v54 = vpop.f32.mrb[9].mxu1  ;;  %v649_v55 = vsel %vm162_vm2, %v642_v53, -inf }
 0x47c   :  { %650 = vmax.xlane.f32.xlu0 %v649_v55 }
 0x492   :  { %744 = vrot.lane.b32.xlu0 %v2080_v13, %s1974_s10 }
 0x496   :  { %820 = vrot.lane.b32.xlu0 %v2086_v15, %s1975_s11 }
 0x4f5   :  { %v648_v56 = vpop.xlane.xlu1 %647 }
 0x4f6   :  { %v652_v57 = vsub.f32 %v564_v46, %v648_v56 }
 0x4f8   :  { %v654_v58 = vmul.f32 1.442695, %v652_v57 }
 0x4fa   :  { %1845 = vpow2.f32 %v654_v58 }
 0x504   :  { %v1846_v59 = vpop.eup %1845 }
 0x505   :  { %v658_v60 = vsel %vm162_vm2, %v1846_v59, 0.0 }
 0x506   :  { %659 = vadd.xlane.f32.xlu1 %v658_v60 }
 0x509   :  { %v651_v61 = vpop.xlane.xlu0 %650 }
 0x50a   :  { %v653_v63 = vsub.f32 %v642_v53, %v651_v61 }
 0x50c   :  { %v656_v0 = vmul.f32 1.442695, %v653_v63 }
 0x50d   :  { %v745_v62 = vpop.permute.xlu0 %744 }
 0x50e   :  { %1745 = vmatpush3.msra.mxu1 %v745_v62  ;;  %1847 = vpow2.f32 %v656_v0 }
 0x50f   :  { %1754 = vmatprep.subr.mxu1 %v1968_v8 }
 0x511   :  { %v821_v9 = vpop.permute.xlu0 %820 }
 0x517   :  { %668 = vrot.lane.b32.xlu1 %v2077_v12, %s1974_s10 }
 0x518   :  { %v1848_v1 = vpop.eup %1847 }
 0x519   :  { %v661_v2 = vsel %vm162_vm2, %v1848_v1, 0.0 }
 0x51b   :  { %822 = vrot.lane.b32.xlu1 %v2077_v12, %s1976_s12 }
 0x51f   :  { %900 = vrot.lane.b32.xlu1 %v2080_v13, %s1976_s12 }
 0x543   :  { %662 = vadd.xlane.f32.xlu1 %v661_v2 }
 0x554   :  { %898 = vrot.lane.b32.xlu1 %v2094_v17, %s1975_s11 }
 0x593   :  { %v660_v3 = vpop.xlane.xlu1 %659 }
 0x594   :  { %1849 = vrcp.f32 %v660_v3 }
 0x597   :  { %v669_v4 = vpop.permute.xlu1 %668 }
 0x598   :  { %1740 = vmatpush3.msra.mxu0 %v669_v4 }
 0x599   :  { %1749 = vmatprep.subr.mxu0 %v1968_v8 }
 0x59b   :  { %v823_v7 = vpop.permute.xlu1 %822 }
 0x59e   :  { %v1850_v5 = vpop.eup %1849 }
 0x59f   :  { %v665_v6 = vmul.f32 %v1850_v5, %v1846_v59  ;;  %v901_v10 = vpop.permute.xlu1 %900 }
 0x5a1   :  { %1742 = vmatmul.mubr.msk.f32.vlgmr.msra.gmra.mrb[4].mxu0 %vm162_vm2, %v665_v6 }
 0x5a2   :  { %1750 = vmatpush3.xpose.msk.msra.mxu0 %vm162_vm2, %v823_v7  ;;  %1751 = vmatprep.mubr.msk.f32.mxu0 %vm1969_vm1, %v1968_v8 }
 0x5a3   :  { %1759 = vmatprep.subr.mxu0 %v1968_v8 }
 0x5a5   :  { %1752 = vmatmul.mubr.msk.f32.vlgmr.msra.gmra.mrb[6].mxu0 %vm162_vm2, %v821_v9 }
 0x5a6   :  { %1761 = vmatprep.mubr.msk.f32.mxu0 %vm1969_vm1, %v1968_v8 }
 0x5d0   :  { %v663_v11 = vpop.xlane.xlu1 %662 }
 0x5d1   :  { %1851 = vrcp.f32 %v663_v11 }
 0x5d4   :  { %v899_v18 = vpop.permute.xlu1 %898 }
 0x5db   :  { %v1852_v14 = vpop.eup %1851 }
 0x5dc   :  { %v667_v16 = vmul.f32 %v1852_v14, %v1848_v1 }
 0x5de   :  { %1747 = vmatmul.mubr.msk.f32.vlgmr.msra.gmra.mrb[10].mxu1 %vm162_vm2, %v667_v16 }
 0x5df   :  { %1755 = vmatpush3.xpose.msk.msra.mxu1 %vm162_vm2, %v901_v10  ;;  %1756 = vmatprep.mubr.msk.f32.mxu1 %vm1969_vm1, %v1968_v8 }
 0x5e0   :  { %1764 = vmatprep.subr.mxu1 %v1968_v8 }
 0x5e2   :  { %1757 = vmatmul.mubr.msk.f32.vlgmr.msra.gmra.mrb[12].mxu1 %vm162_vm2, %v899_v18  ;;  %v1512_v18 = vld [vmem:[#allocation7] sm:$0xff] }
 0x5e3   :  { %1766 = vmatprep.mubr.msk.f32.mxu1 %vm1969_vm1, %v1968_v8 }
 0x674   :  { %v2161_v19 = vpop.f32.mrb[4].mxu0 }
 0x675   :  { %v1743_v20 = vpop.f32.mrb[5].mxu0 }
 0x676   :  { %v1514_v20 = vld [vmem:[#allocation7 + $0x10] sm:$0xff] }
 0x678   :  { %v894_v21 = vpop.f32.mrb[6].mxu0 }
 0x679   :  { %v1753_v22 = vpop.f32.mrb[7].mxu0  ;;  %v976_v23 = vsel %vm162_vm2, %v894_v21, -inf }
 0x67a   :  { %977 = vmax.xlane.f32.xlu0 %v976_v23 }
 0x6b1   :  { %v2164_v24 = vpop.f32.mrb[10].mxu1 }
 0x6b2   :  { %v1748_v25 = vpop.f32.mrb[11].mxu1 }
 0x6b5   :  { %v972_v26 = vpop.f32.mrb[12].mxu1 }
 0x6b6   :  { %v1758_v27 = vpop.f32.mrb[13].mxu1  ;;  %v979_v28 = vsel %vm162_vm2, %v972_v26, -inf }
 0x6b7   :  { %980 = vmax.xlane.f32.xlu1 %v979_v28 }
 0x6c8   :  { %998 = vrot.lane.b32.xlu1 %v2077_v12, %s1977_s13 }
 0x6cc   :  { %1152 = vrot.lane.b32.xlu1 %v2077_v12, %s1978_s14 }
 0x6d0   :  { %1230 = vrot.lane.b32.xlu1 %v2080_v13, %s1978_s14 }
 0x6d4   :  { %1228 = vrot.lane.b32.xlu1 %v2094_v17, %s1979_s15 }
 0x707   :  { %v978_v29 = vpop.xlane.xlu0 %977 }
 0x708   :  { %v982_v30 = vsub.f32 %v894_v21, %v978_v29 }
 0x70a   :  { %v984_v31 = vmul.f32 1.442695, %v982_v30 }
 0x70c   :  { %1853 = vpow2.f32 %v984_v31 }
 0x716   :  { %v1854_v32 = vpop.eup %1853 }
 0x717   :  { %v988_v33 = vsel %vm162_vm2, %v1854_v32, 0.0 }
 0x718   :  { %989 = vadd.xlane.f32.xlu0 %v988_v33 }
 0x72e   :  { %1074 = vrot.lane.b32.xlu0 %v2080_v13, %s1977_s13 }
 0x744   :  { %v981_v34 = vpop.xlane.xlu1 %980 }
 0x745   :  { %v983_v35 = vsub.f32 %v972_v26, %v981_v34 }
 0x747   :  { %v986_v36 = vmul.f32 1.442695, %v983_v35 }
 0x748   :  { %v999_v37 = vpop.permute.xlu1 %998 }
 0x749   :  { %1855 = vpow2.f32 %v986_v36  ;;  %1760 = vmatpush3.msra.mxu0 %v999_v37 }
 0x74a   :  { %1769 = vmatprep.subr.mxu0 %v1968_v8 }
 0x74c   :  { %v1153_v43 = vpop.permute.xlu1 %1152 }
 0x750   :  { %v1231_v46 = vpop.permute.xlu1 %1230 }
 0x753   :  { %v1856_v38 = vpop.eup %1855 }
 0x754   :  { %v991_v17 = vsel %vm162_vm2, %v1856_v38, 0.0  ;;  %v1229_v48 = vpop.permute.xlu1 %1228 }
 0x755   :  { %992 = vadd.xlane.f32.xlu0 %v991_v17 }
 0x76b   :  { %1150 = vrot.lane.b32.xlu0 %v2086_v15, %s1979_s15 }
 0x7a5   :  { %v990_v39 = vpop.xlane.xlu0 %989 }
 0x7a6   :  { %1857 = vrcp.f32 %v990_v39 }
 0x7a9   :  { %v1075_v40 = vpop.permute.xlu0 %1074 }
 0x7aa   :  { %1765 = vmatpush3.msra.mxu1 %v1075_v40 }
 0x7ab   :  { %1774 = vmatprep.subr.mxu1 %v1968_v8 }
 0x7b0   :  { %v1858_v41 = vpop.eup %1857 }
 0x7b1   :  { %v995_v42 = vmul.f32 %v1858_v41, %v1854_v32 }
 0x7b3   :  { %1762 = vmatmul.mubr.msk.f32.vlgmr.msra.gmra.mrb[8].mxu0 %vm162_vm2, %v995_v42 }
 0x7b4   :  { %1770 = vmatpush3.xpose.msk.msra.mxu0 %vm162_vm2, %v1153_v43  ;;  %1771 = vmatprep.mubr.msk.f32.mxu0 %vm1969_vm1, %v1968_v8 }
 0x7b5   :  { %1779 = vmatprep.subr.mxu0 %v1968_v8 }
 0x7e2   :  { %v993_v44 = vpop.xlane.xlu0 %992 }
 0x7e3   :  { %1859 = vrcp.f32 %v993_v44 }
 0x7e6   :  { %v1151_v15 = vpop.permute.xlu0 %1150 }
 0x7e7   :  { %1772 = vmatmul.mubr.msk.f32.vlgmr.msra.gmra.mrb[10].mxu0 %vm162_vm2, %v1151_v15 }
 0x7e8   :  { %1781 = vmatprep.mubr.msk.f32.mxu0 %vm1969_vm1, %v1968_v8 }
 0x7ed   :  { %v1860_v45 = vpop.eup %1859 }
 0x7ee   :  { %v997_v47 = vmul.f32 %v1860_v45, %v1856_v38 }
 0x7f0   :  { %1767 = vmatmul.mubr.msk.f32.vlgmr.msra.gmra.mrb[14].mxu1 %vm162_vm2, %v997_v47 }
 0x7f1   :  { %1775 = vmatpush3.xpose.msk.msra.mxu1 %vm162_vm2, %v1231_v46  ;;  %1776 = vmatprep.mubr.msk.f32.mxu1 %vm1969_vm1, %v1968_v8 }
 0x7f2   :  { %1784 = vmatprep.subr.mxu1 %v1968_v8 }
 0x7f4   :  { %1777 = vmatmul.mubr.msk.f32.vlgmr.msra.gmra.mrb[16].mxu1 %vm162_vm2, %v1229_v48 }
 0x7f5   :  { %1786 = vmatprep.mubr.msk.f32.mxu1 %vm1969_vm1, %v1968_v8 }
 0x886   :  { %v1070_v50 = vpop.f32.mrb[8].mxu0 }
 0x887   :  { %v1763_v52 = vpop.f32.mrb[9].mxu0 }
 0x8ba   :  { %v1224_v53 = vpop.f32.mrb[10].mxu0 }
 0x8bb   :  { %v1773_v54 = vpop.f32.mrb[11].mxu0  ;;  %v1306_v55 = vsel %vm162_vm2, %v1224_v53, -inf }
 0x8bc   :  { %1307 = vmax.xlane.f32.xlu0 %v1306_v55 }
 0x8c3   :  { %v1146_v56 = vpop.f32.mrb[14].mxu1 }
 0x8c4   :  { %v1768_v57 = vpop.f32.mrb[15].mxu1 }
 0x8c7   :  { %v1302_v58 = vpop.f32.mrb[16].mxu1 }
 0x8c8   :  { %v1778_v59 = vpop.f32.mrb[17].mxu1  ;;  %v1309_v60 = vsel %vm162_vm2, %v1302_v58, -inf }
 0x8c9   :  { %1310 = vmax.xlane.f32.xlu1 %v1309_v60 }
 0x8da   :  { %1328 = vrot.lane.b32.xlu1 %v2077_v12, %s1980_s16 }
 0x8de   :  { %1482 = vrot.lane.b32.xlu1 %v2161_v19, %s1966_s6  ;;  %v1513_v19 = vld [vmem:[#allocation7 + $0x8] sm:$0xff] }
 0x8df   :  { %v1808_v21 = vpack.c.bf16 %v1513_v19, %v1512_v18 }
 0x8e2   :  { %1484 = vrot.lane.b32.xlu1 %v2164_v24, %s1966_s6 }
 0x8e6   :  { %1492 = vrot.lane.b32.xlu1 %v1146_v56, %s1981_s1 }
 0x949   :  { %v1308_v8 = vpop.xlane.xlu0 %1307 }
 0x94a   :  { %v1312_v61 = vsub.f32 %v1224_v53, %v1308_v8 }
 0x94c   :  { %v1314_v62 = vmul.f32 1.442695, %v1312_v61 }
 0x94e   :  { %1861 = vpow2.f32 %v1314_v62 }
 0x956   :  { %v1311_v63 = vpop.xlane.xlu1 %1310 }
 0x957   :  { %v1313_v0 = vsub.f32 %v1302_v58, %v1311_v63 }
 0x958   :  { %v1862_v1 = vpop.eup %1861 }
 0x959   :  { %v1316_v2 = vmul.f32 1.442695, %v1313_v0  ;;  %v1318_v3 = vsel %vm162_vm2, %v1862_v1, 0.0 }
 0x95a   :  { %1319 = vadd.xlane.f32.xlu0 %v1318_v3  ;;  %v1329_v12 = vpop.permute.xlu1 %1328 }
 0x95b   :  { %1863 = vpow2.f32 %v1316_v2  ;;  %1780 = vmatpush3.msra.mxu0 %v1329_v12 }
 0x95c   :  { %1809 = vmatprep.subr.bf16.mxu0 %v1808_v21 }
 0x95e   :  { %v1483_v27 = vpop.permute.xlu1 %1482 }
 0x95f   :  { %v1504_v29 = vsel %vm162_vm2, %v2130_v49, %v1483_v27  ;;  %v1651_v49 = vld [vmem:[%s2235_s4] ss:$0 sm:$0xff] }
 0x962   :  { %v1485_v33 = vpop.permute.xlu1 %1484 }
 0x963   :  { %v1505_v35 = vsel %vm162_vm2, %v2132_v51, %v1485_v33 }
 0x965   :  { %v1864_v4 = vpop.eup %1863 }
 0x966   :  { %v1321_v5 = vsel %vm162_vm2, %v1864_v4, 0.0  ;;  %v1493_v34 = vpop.permute.xlu1 %1492 }
 0x967   :  { %1322 = vadd.xlane.f32.xlu0 %v1321_v5  ;;  %v1508_v36 = vsel %vm1506_vm4, %v1505_v35, %v1493_v34 }
 0x97d   :  { %1404 = vrot.lane.b32.xlu0 %v2080_v13, %s1980_s16  ;;  %v1515_v13 = vld [vmem:[#allocation7 + $0x18] sm:$0xff] }
 0x97e   :  { %v1812_v22 = vpack.c.bf16 %v1515_v13, %v1514_v20 }
 0x981   :  { %1490 = vrot.lane.b32.xlu0 %v1070_v50, %s1981_s1 }
 0x9e7   :  { %v1320_v6 = vpop.xlane.xlu0 %1319 }
 0x9e8   :  { %1865 = vrcp.f32 %v1320_v6 }
 0x9f2   :  { %v1866_v7 = vpop.eup %1865 }
 0x9f3   :  { %v1325_v9 = vmul.f32 %v1866_v7, %v1862_v1 }
 0x9f4   :  { %v1323_v10 = vpop.xlane.xlu0 %1322 }
 0x9f5   :  { %1867 = vrcp.f32 %v1323_v10  ;;  %1782 = vmatmul.mubr.msk.f32.vlgmr.msra.gmra.mrb[12].mxu0 %vm162_vm2, %v1325_v9 }
 0x9f6   :  { %1811 = vmatpush3.bf16.msra.mxu0 %v1808_v21 }
 0x9f7   :  { %1813 = vmatprep.subr.bf16.mxu0 %v1812_v22 }
 0x9f8   :  { %v1405_v11 = vpop.permute.xlu0 %1404 }
 0x9f9   :  { %1785 = vmatpush3.msra.mxu1 %v1405_v11 }
 0x9fa   :  { %1815 = vmatpush3.bf16.msra.mxu0 %v1812_v22 }
 0x9fc   :  { %v1491_v28 = vpop.permute.xlu0 %1490 }
 0x9fd   :  { %v1507_v30 = vsel %vm1506_vm4, %v1504_v29, %v1491_v28 }
 0x9ff   :  { %v1868_v14 = vpop.eup %1867 }
 0xa00   :  { %v1327_v16 = vmul.f32 %v1868_v14, %v1864_v4 }
 0xa02   :  { %1787 = vmatmul.mubr.msk.f32.vlgmr.msra.gmra.mrb[18].mxu1 %vm162_vm2, %v1327_v16 }
 0xac8   :  { %v1400_v23 = vpop.f32.mrb[12].mxu0 }
 0xac9   :  { %1498 = vrot.lane.b32.xlu0 %v1400_v23, %s1982_s17  ;;  %v1783_v24 = vpop.f32.mrb[13].mxu0 }
 0xad5   :  { %v1476_v25 = vpop.f32.mrb[18].mxu1 }
 0xad6   :  { %1500 = vrot.lane.b32.xlu1 %v1476_v25, %s1982_s17  ;;  %v1788_v26 = vpop.f32.mrb[19].mxu1 }
 0xb3b   :  { %v1499_v31 = vpop.permute.xlu0 %1498 }
 0xb3c   :  { %v1510_v32 = vsel %vm1509_vm3, %v1507_v30, %v1499_v31 }
 0xb3d   :  { %1797 = vmatprep.mubr.msk.f32.mxu0 %vm75_vm0, %v1510_v32 }
 0xb48   :  { %v1501_v37 = vpop.permute.xlu1 %1500 }
 0xb49   :  { %v1511_v38 = vsel %vm1509_vm3, %v1508_v36, %v1501_v37 }
 0xb4a   :  { %1798 = vmatmul.mubr.msk.f32.vlgmr.msra.gmra.mrb[14].mxu0 %vm75_vm0, %v1511_v38 }
 0xc1d   :  { %v1799_v17 = vpop.f32.mrb[14].mxu0 }
 0xc1e   :  { %v1601_v39 = vadd.f32 %v1799_v17, %v1651_v49  ;;  %v1595_v40 = vpop.f32.mrb[15].mxu0 }
 0xc1f   :  { %v1596_v41 = vadd.f32 %v1651_v49, %v1595_v40 }
 0xc20   :  { %1605 = vst.msk [vmem:[#allocation8 + $0x8] sm:$0xff] %vm75_vm0, %v1601_v39 }
 0xc21   :  { %1604 = vst.msk [vmem:[#allocation8] sm:$0xff] %vm75_vm0, %v1596_v41 }
 0xc22   :  { %1946 = shalt.err (!%p1943_p0)
}
 0xc23   :  { %s1947_s25 = scalar_lea.hbm %s2236_s5, 256 }
 0xc24   :  { %p1948_p1 = scmp.ne.s32.totalorder %s2236_s5, %s1947_s25  ;;  %p1951_p2 = scmp.lt.u32.totalorder %s1947_s25, %s2236_s5 }
 0xc26   :  { %p1953_p3 = pnand %p1951_p2, %p1948_p1 }
 0xc28   :  { %1956 = shalt.err (!%p1953_p3)
}
 0xc29   :  { %1617 = dma.vmem_to_hbm [thread:$0]  %s1612_s22, 256, %s2236_s5, [#allocation4], %s1965_s30, %s1965_s30, %s1966_s6  }
 0xc2a   :  { %1961 = dma.done.wait [#allocation4], 256  }
 0xc2b   :  { %1962 = vsyncadd [#allocation4], 4294967040 }
 0xc2c   :  { %1621 = vsyncpa [#allocation3], 1 }
 0xc2d   :  { %1622 = vsyncpa [#allocation6], 1 }
 0xc2e   :  { %1623 = vsyncpa [#allocation4], 1 }

</bundles_post_ra>
